<compile_context>
chip_gen: v7x
topology: tpu7x:2x2x1
jax: 0.10.0
libtpu: 0.0.40
codegen_flags: <defaults>
</compile_context>

<pallas_src>
import functools

import jax
import jax.numpy as jnp
from jax import lax
from jax.experimental import pallas as pl
from jax.experimental.pallas import tpu as pltpu

_LN_EPS = 1e-5  # matches torch.nn.LayerNorm default


# ---------------------------------------------------------------------------
# In-kernel helpers
# ---------------------------------------------------------------------------
def _layer_norm(x, gamma, beta):
    """LayerNorm over the last (feature) axis. x: (..., F); gamma/beta: (1, F)."""
    x = x.astype(jnp.float32)
    mu = jnp.mean(x, axis=-1, keepdims=True)
    var = jnp.mean(jnp.square(x - mu), axis=-1, keepdims=True)
    return (x - mu) * lax.rsqrt(var + _LN_EPS) * gamma + beta


def _multi_head_attention(q_in, kv_in, wq, bq, wk, bk, wv, bv, wo, bo,
                          *, num_heads, causal):
    """q_in: (Tq, F), kv_in: (Tk, F) -> (Tq, F). All matmuls go to the MXU."""
    q = jnp.dot(q_in, wq, preferred_element_type=jnp.float32) + bq
    k = jnp.dot(kv_in, wk, preferred_element_type=jnp.float32) + bk
    v = jnp.dot(kv_in, wv, preferred_element_type=jnp.float32) + bv

    t_q, d_model = q.shape
    t_k = k.shape[0]
    d_head = d_model // num_heads
    scale = 1.0 / float(d_head) ** 0.5

    if causal:
        row = lax.broadcasted_iota(jnp.int32, (t_q, t_k), 0)
        col = lax.broadcasted_iota(jnp.int32, (t_q, t_k), 1)
        allowed = col <= row  # subsequent_mask: attend to self and past only

    out = jnp.zeros((t_q, d_model), jnp.float32)
    for h in range(num_heads):                      # static unroll over heads
        sl = slice(h * d_head, (h + 1) * d_head)
        qh, kh, vh = q[:, sl], k[:, sl], v[:, sl]
        # scores = qh @ kh^T (contract the head dim of both operands)
        s = lax.dot_general(qh, kh, (((1,), (1,)), ((), ())),
                            preferred_element_type=jnp.float32) * scale
        if causal:
            s = jnp.where(allowed, s, jnp.float32(-1e30))
        s = s - jnp.max(s, axis=-1, keepdims=True)
        p = jnp.exp(s)
        p = p / jnp.sum(p, axis=-1, keepdims=True)
        head = jnp.dot(p, vh, preferred_element_type=jnp.float32)      # (Tq, dh)
        # concat-free output projection: sum_h head_h @ Wo[h*dh:(h+1)*dh, :]
        out = out + jnp.dot(head, wo[sl, :], preferred_element_type=jnp.float32)
    return out + bo


# ---------------------------------------------------------------------------
# Kernels (one fused SublayerConnection each)
# ---------------------------------------------------------------------------
def _self_attn_sublayer_kernel(x_ref, gamma_ref, beta_ref,
                               wq_ref, bq_ref, wk_ref, bk_ref,
                               wv_ref, bv_ref, wo_ref, bo_ref,
                               o_ref, *, num_heads):
    x = x_ref[...].astype(jnp.float32)                      # (T', F)
    xn = _layer_norm(x, gamma_ref[...], beta_ref[...])
    attn = _multi_head_attention(
        xn, xn,
        wq_ref[...], bq_ref[...], wk_ref[...], bk_ref[...],
        wv_ref[...], bv_ref[...], wo_ref[...], bo_ref[...],
        num_heads=num_heads, causal=True)
    # TODO(synk): dropout treated as identity (inference / p=0); training-mode
    # dropout would use pltpu.prng_seed / prng_random_bits here.
    o_ref[...] = (x + attn).astype(o_ref.dtype)


def _cross_attn_sublayer_kernel(x_ref, m_ref, gamma_ref, beta_ref,
                                wq_ref, bq_ref, wk_ref, bk_ref,
                                wv_ref, bv_ref, wo_ref, bo_ref,
                                o_ref, *, num_heads):
    x = x_ref[...].astype(jnp.float32)                      # (T', F)
    m = m_ref[...].astype(jnp.float32)                      # (T,  F) raw memory
    xn = _layer_norm(x, gamma_ref[...], beta_ref[...])
    attn = _multi_head_attention(
        xn, m,
        wq_ref[...], bq_ref[...], wk_ref[...], bk_ref[...],
        wv_ref[...], bv_ref[...], wo_ref[...], bo_ref[...],
        num_heads=num_heads, causal=False)
    o_ref[...] = (x + attn).astype(o_ref.dtype)


def _gcn_sublayer_kernel(x_ref, adj_ref, gamma_ref, beta_ref, w_ref, b_ref, o_ref):
    # x_ref: (N, F) slab for one (batch, time) grid point; adj: (N, N); w: (F, F)
    x = x_ref[...].astype(jnp.float32)
    xn = _layer_norm(x, gamma_ref[...], beta_ref[...])
    agg = jnp.dot(adj_ref[...].astype(jnp.float32), xn,
                  preferred_element_type=jnp.float32)               # node mixing
    h = jnp.dot(agg, w_ref[...].astype(jnp.float32),
                preferred_element_type=jnp.float32) + b_ref[...]
    o_ref[...] = (x + jnp.maximum(h, 0.0)).astype(o_ref.dtype)


# ---------------------------------------------------------------------------
# pallas_call wrappers
# ---------------------------------------------------------------------------
_VMEM_LIMIT = 32 * 1024 * 1024


def _self_attn_sublayer(x3, ln, attn, num_heads):
    rows, t_q, d_model = x3.shape
    xspec = pl.BlockSpec((None, t_q, d_model), lambda i: (i, 0, 0))
    wspec = pl.BlockSpec((d_model, d_model), lambda i: (0, 0))
    vspec = pl.BlockSpec((1, d_model), lambda i: (0, 0))
    cost = pl.CostEstimate(
        flops=int(rows * (8 * t_q * d_model * d_model + 4 * t_q * t_q * d_model)),
        transcendentals=int(rows * num_heads * t_q * t_q),
        bytes_accessed=int(4 * (2 * rows * t_q * d_model
                                + 4 * d_model * d_model + 6 * d_model)))
    return pl.pallas_call(
        functools.partial(_self_attn_sublayer_kernel, num_heads=num_heads),
        out_shape=jax.ShapeDtypeStruct((rows, t_q, d_model), x3.dtype),
        grid=(rows,),
        in_specs=[xspec, vspec, vspec,
                  wspec, vspec, wspec, vspec, wspec, vspec, wspec, vspec],
        out_specs=xspec,
        compiler_params=pltpu.CompilerParams(
            dimension_semantics=("parallel",), vmem_limit_bytes=_VMEM_LIMIT),
        cost_estimate=cost,
    )(x3, ln["gamma"], ln["beta"],
      attn["wq"], attn["bq"], attn["wk"], attn["bk"],
      attn["wv"], attn["bv"], attn["wo"], attn["bo"])


def _cross_attn_sublayer(x3, m3, ln, attn, num_heads):
    rows, t_q, d_model = x3.shape
    t_k = m3.shape[1]
    xspec = pl.BlockSpec((None, t_q, d_model), lambda i: (i, 0, 0))
    mspec = pl.BlockSpec((None, t_k, d_model), lambda i: (i, 0, 0))
    wspec = pl.BlockSpec((d_model, d_model), lambda i: (0, 0))
    vspec = pl.BlockSpec((1, d_model), lambda i: (0, 0))
    cost = pl.CostEstimate(
        flops=int(rows * (4 * t_q * d_model * d_model + 4 * t_k * d_model * d_model
                          + 4 * t_q * t_k * d_model)),
        transcendentals=int(rows * num_heads * t_q * t_k),
        bytes_accessed=int(4 * (2 * rows * t_q * d_model + rows * t_k * d_model
                                + 4 * d_model * d_model + 6 * d_model)))
    return pl.pallas_call(
        functools.partial(_cross_attn_sublayer_kernel, num_heads=num_heads),
        out_shape=jax.ShapeDtypeStruct((rows, t_q, d_model), x3.dtype),
        grid=(rows,),
        in_specs=[xspec, mspec, vspec, vspec,
                  wspec, vspec, wspec, vspec, wspec, vspec, wspec, vspec],
        out_specs=xspec,
        compiler_params=pltpu.CompilerParams(
            dimension_semantics=("parallel",), vmem_limit_bytes=_VMEM_LIMIT),
        cost_estimate=cost,
    )(x3, m3, ln["gamma"], ln["beta"],
      attn["wq"], attn["bq"], attn["wk"], attn["bk"],
      attn["wv"], attn["bv"], attn["wo"], attn["bo"])


def _gcn_sublayer(x4t, adj, ln, gcn):
    # x4t: (B, T', N, F) — node axis second-minor so the kernel block's last two
    # dims are (N, F) = full array dims (lane-dense, (8,128) rule satisfied).
    b, t_q, n, d_model = x4t.shape
    xspec = pl.BlockSpec((None, None, n, d_model), lambda bi, ti: (bi, ti, 0, 0))
    aspec = pl.BlockSpec((n, n), lambda bi, ti: (0, 0))
    wspec = pl.BlockSpec((d_model, d_model), lambda bi, ti: (0, 0))
    vspec = pl.BlockSpec((1, d_model), lambda bi, ti: (0, 0))
    cost = pl.CostEstimate(
        flops=int(b * t_q * (2 * n * n * d_model + 2 * n * d_model * d_model)),
        transcendentals=0,
        bytes_accessed=int(4 * (2 * b * t_q * n * d_model + n * n
                                + d_model * d_model + 3 * d_model)))
    return pl.pallas_call(
        _gcn_sublayer_kernel,
        out_shape=jax.ShapeDtypeStruct((b, t_q, n, d_model), x4t.dtype),
        grid=(b, t_q),
        in_specs=[xspec, aspec, vspec, vspec, wspec, vspec],
        out_specs=xspec,
        compiler_params=pltpu.CompilerParams(
            dimension_semantics=("parallel", "parallel"),
            vmem_limit_bytes=_VMEM_LIMIT),
        cost_estimate=cost,
    )(x4t, adj, ln["gamma"], ln["beta"], gcn["w"], gcn["b"])


def decoder_layer_forward(x, memory, params, *, num_heads):
    """x: (B, N, T', F); memory: (B, N, T, F) -> (B, N, T', F)."""
    b, n, t_q, d_model = x.shape
    t_k = memory.shape[2]
    assert d_model % num_heads == 0
    xf = x.reshape(b * n, t_q, d_model)
    mf = memory.reshape(b * n, t_k, d_model)

    # sublayer[0]: x + SelfAttn(LN(x)) with causal mask      (fused kernel)
    y = _self_attn_sublayer(xf, params["ln0"], params["self_attn"], num_heads)
    # sublayer[1]: y + SrcAttn(LN(y), memory, memory)        (fused kernel)
    y = _cross_attn_sublayer(y, mf, params["ln1"], params["src_attn"], num_heads)
    # sublayer[2]: y + ReLU(A_norm @ LN(y) @ W + b)          (fused GCN kernel)
    y4 = y.reshape(b, n, t_q, d_model)
    yt = jnp.transpose(y4, (0, 2, 1, 3))           # layout glue for the GCN grid
    ot = _gcn_sublayer(yt, params["adj"], params["ln2"], params["gcn"])
    return jnp.transpose(ot, (0, 2, 1, 3))


# ---------------------------------------------------------------------------
# Pure-JAX reference (mirrors the PyTorch forward)
# ---------------------------------------------------------------------------
def _ref_layer_norm(x, gamma, beta):
    mu = x.mean(-1, keepdims=True)
    var = ((x - mu) ** 2).mean(-1, keepdims=True)
    return (x - mu) / jnp.sqrt(var + _LN_EPS) * gamma + beta


def _ref_mha(q_in, kv_in, p, num_heads, causal):
    q = q_in @ p["wq"] + p["bq"]
    k = kv_in @ p["wk"] + p["bk"]
    v = kv_in @ p["wv"] + p["bv"]
    r, t_q, d_model = q.shape
    t_k = k.shape[1]
    d_head = d_model // num_heads
    qh = q.reshape(r, t_q, num_heads, d_head).transpose(0, 2, 1, 3)
    kh = k.reshape(r, t_k, num_heads, d_head).transpose(0, 2, 1, 3)
    vh = v.reshape(r, t_k, num_heads, d_head).transpose(0, 2, 1, 3)
    s = jnp.einsum("rhqd,rhkd->rhqk", qh, kh) / jnp.sqrt(float(d_head))
    if causal:
        s = jnp.where(jnp.tril(jnp.ones((t_q, t_k), bool)), s, -1e30)
    a = jax.nn.softmax(s, axis=-1)
    o = jnp.einsum("rhqk,rhkd->rhqd", a, vh).transpose(0, 2, 1, 3).reshape(r, t_q, d_model)
    return o @ p["wo"] + p["bo"]


def reference_decoder_layer(x, memory, params, *, num_heads):
    b, n, t_q, d_model = x.shape
    t_k = memory.shape[2]
    xf = x.reshape(b * n, t_q, d_model)
    mf = memory.reshape(b * n, t_k, d_model)
    xn = _ref_layer_norm(xf, params["ln0"]["gamma"], params["ln0"]["beta"])
    y = xf + _ref_mha(xn, xn, params["self_attn"], num_heads, causal=True)
    yn = _ref_layer_norm(y, params["ln1"]["gamma"], params["ln1"]["beta"])
    y = y + _ref_mha(yn, mf, params["src_attn"], num_heads, causal=False)
    y4 = y.reshape(b, n, t_q, d_model)
    yn = _ref_layer_norm(y4, params["ln2"]["gamma"], params["ln2"]["beta"])
    agg = jnp.einsum("mn,bntf->bmtf", params["adj"], yn)
    h = jax.nn.relu(jnp.einsum("bntf,fg->bntg", agg, params["gcn"]["w"])
                    + params["gcn"]["b"])
    return y4 + h


# ---------------------------------------------------------------------------
# Parameter construction + test
# ---------------------------------------------------------------------------
def init_params(key, d_model, num_nodes):
    def lin(kw, kb):
        w = jax.random.normal(kw, (d_model, d_model), jnp.float32) / jnp.sqrt(
            jnp.float32(d_model))
        b = jax.random.normal(kb, (1, d_model), jnp.float32) * 0.02
        return w, b

    def attn_params(k):
        kk = jax.random.split(k, 8)
        wq, bq = lin(kk[0], kk[1]); wk, bk = lin(kk[2], kk[3])
        wv, bv = lin(kk[4], kk[5]); wo, bo = lin(kk[6], kk[7])
        return dict(wq=wq, bq=bq, wk=wk, bk=bk, wv=wv, bv=bv, wo=wo, bo=bo)

    def ln_params():
        return dict(gamma=jnp.ones((1, d_model), jnp.float32),
                    beta=jnp.zeros((1, d_model), jnp.float32))

    ks = jax.random.split(key, 4)
    wg, bg = lin(ks[2], ks[3])

    # deterministic ring adjacency with self-loops, symmetric normalization
    idx = jnp.arange(num_nodes)
    adj = jnp.eye(num_nodes, dtype=jnp.float32)
    adj = adj.at[idx, (idx + 1) % num_nodes].set(1.0)
    adj = adj.at[idx, (idx - 1) % num_nodes].set(1.0)
    dinv = 1.0 / jnp.sqrt(adj.sum(-1))
    adj = adj * dinv[:, None] * dinv[None, :]

    return dict(self_attn=attn_params(ks[0]), src_attn=attn_params(ks[1]),
                gcn=dict(w=wg, b=bg), adj=adj,
                ln0=ln_params(), ln1=ln_params(), ln2=ln_params())


if __name__ == "__main__":
    key = jax.random.PRNGKey(0)
    B, N, T_DEC, T_ENC, D_MODEL, HEADS = 2, 4, 8, 16, 32, 4
    k_x, k_m, k_p = jax.random.split(key, 3)
    x = jax.random.normal(k_x, (B, N, T_DEC, D_MODEL), jnp.float32)
    memory = jax.random.normal(k_m, (B, N, T_ENC, D_MODEL), jnp.float32)
    params = init_params(k_p, D_MODEL, N)

    out = decoder_layer_forward(x, memory, params, num_heads=HEADS)
    out = jax.block_until_ready(out)

    ref = reference_decoder_layer(x, memory, params, num_heads=HEADS)
    assert out.shape == (B, N, T_DEC, D_MODEL)
    assert jnp.allclose(out, ref, atol=2e-4, rtol=2e-4), (
        "mismatch vs reference, max abs diff = %s" % jnp.max(jnp.abs(out - ref)))

    print("KERNEL_OK")
</pallas_src>

<mosaic_0001>
module attributes {stable_mosaic.version = 11 : i64} {
  func.func @_self_attn_sublayer_kernel(%arg0: i32, %arg1: memref<1x8x32xf32, #tpu.memory_space<vmem>>, %arg2: memref<1x32xf32, #tpu.memory_space<vmem>>, %arg3: memref<1x32xf32, #tpu.memory_space<vmem>>, %arg4: memref<32x32xf32, #tpu.memory_space<vmem>>, %arg5: memref<1x32xf32, #tpu.memory_space<vmem>>, %arg6: memref<32x32xf32, #tpu.memory_space<vmem>>, %arg7: memref<1x32xf32, #tpu.memory_space<vmem>>, %arg8: memref<32x32xf32, #tpu.memory_space<vmem>>, %arg9: memref<1x32xf32, #tpu.memory_space<vmem>>, %arg10: memref<32x32xf32, #tpu.memory_space<vmem>>, %arg11: memref<1x32xf32, #tpu.memory_space<vmem>>, %arg12: memref<1x8x32xf32, #tpu.memory_space<vmem>>) attributes {dimension_semantics = [#tpu.dimension_semantics<parallel>], iteration_bounds = array<i64: 8>, scalar_prefetch = 0 : i64, scratch_operands = 0 : i64, tpu.core_type = #tpu.core_type<tc>, window_params = [{transform_indices = @transform_0, window_bounds = array<i64: 1, 8, 32>}, {pipeline_mode = #tpu.pipeline_mode<synchronous>, transform_indices = @transform_1, window_bounds = array<i64: 1, 32>}, {pipeline_mode = #tpu.pipeline_mode<synchronous>, transform_indices = @transform_2, window_bounds = array<i64: 1, 32>}, {pipeline_mode = #tpu.pipeline_mode<synchronous>, transform_indices = @transform_3, window_bounds = array<i64: 32, 32>}, {pipeline_mode = #tpu.pipeline_mode<synchronous>, transform_indices = @transform_4, window_bounds = array<i64: 1, 32>}, {pipeline_mode = #tpu.pipeline_mode<synchronous>, transform_indices = @transform_5, window_bounds = array<i64: 32, 32>}, {pipeline_mode = #tpu.pipeline_mode<synchronous>, transform_indices = @transform_6, window_bounds = array<i64: 1, 32>}, {pipeline_mode = #tpu.pipeline_mode<synchronous>, transform_indices = @transform_7, window_bounds = array<i64: 32, 32>}, {pipeline_mode = #tpu.pipeline_mode<synchronous>, transform_indices = @transform_8, window_bounds = array<i64: 1, 32>}, {pipeline_mode = #tpu.pipeline_mode<synchronous>, transform_indices = @transform_9, window_bounds = array<i64: 32, 32>}, {pipeline_mode = #tpu.pipeline_mode<synchronous>, transform_indices = @transform_10, window_bounds = array<i64: 1, 32>}, {transform_indices = @transform_11, window_bounds = array<i64: 1, 8, 32>}]} {
    %c0 = arith.constant 0 : index
    %c0_0 = arith.constant 0 : index
    %c0_1 = arith.constant 0 : index
    %0 = vector.load %arg1[%c0, %c0_0, %c0_1] : memref<1x8x32xf32, #tpu.memory_space<vmem>>, vector<1x8x32xf32>
    %1 = vector.shape_cast %0 : vector<1x8x32xf32> to vector<8x32xf32>
    %c0_2 = arith.constant 0 : index
    %c0_3 = arith.constant 0 : index
    %2 = vector.load %arg2[%c0_2, %c0_3] : memref<1x32xf32, #tpu.memory_space<vmem>>, vector<1x32xf32>
    %c0_4 = arith.constant 0 : index
    %c0_5 = arith.constant 0 : index
    %3 = vector.load %arg3[%c0_4, %c0_5] : memref<1x32xf32, #tpu.memory_space<vmem>>, vector<1x32xf32>
    %cst = arith.constant dense<0.000000e+00> : vector<8xf32>
    %4 = vector.multi_reduction <add>, %1, %cst [1] : vector<8x32xf32> to vector<8xf32>
    %5 = vector.shape_cast %4 : vector<8xf32> to vector<8x1xf32>
    %cst_6 = arith.constant 3.200000e+01 : f32
    %6 = vector.broadcast %cst_6 : f32 to vector<8x1xf32>
    %7 = arith.divf %5, %6 : vector<8x1xf32>
    %8 = vector.broadcast %7 : vector<8x1xf32> to vector<8x32xf32>
    %9 = arith.subf %1, %8 : vector<8x32xf32>
    %10 = arith.mulf %9, %9 : vector<8x32xf32>
    %cst_7 = arith.constant dense<0.000000e+00> : vector<8xf32>
    %11 = vector.multi_reduction <add>, %10, %cst_7 [1] : vector<8x32xf32> to vector<8xf32>
    %12 = vector.shape_cast %11 : vector<8xf32> to vector<8x1xf32>
    %cst_8 = arith.constant 3.200000e+01 : f32
    %13 = vector.broadcast %cst_8 : f32 to vector<8x1xf32>
    %14 = arith.divf %12, %13 : vector<8x1xf32>
    %15 = vector.broadcast %7 : vector<8x1xf32> to vector<8x32xf32>
    %16 = arith.subf %1, %15 : vector<8x32xf32>
    %cst_9 = arith.constant 9.99999974E-6 : f32
    %17 = vector.broadcast %cst_9 : f32 to vector<8x1xf32>
    %18 = arith.addf %14, %17 : vector<8x1xf32>
    %19 = math.rsqrt %18 : vector<8x1xf32>
    %20 = vector.broadcast %19 : vector<8x1xf32> to vector<8x32xf32>
    %21 = arith.mulf %16, %20 : vector<8x32xf32>
    %22 = vector.broadcast %2 : vector<1x32xf32> to vector<8x32xf32>
    %23 = arith.mulf %21, %22 : vector<8x32xf32>
    %24 = vector.broadcast %3 : vector<1x32xf32> to vector<8x32xf32>
    %25 = arith.addf %23, %24 : vector<8x32xf32>
    %c0_10 = arith.constant 0 : index
    %c0_11 = arith.constant 0 : index
    %26 = vector.load %arg4[%c0_10, %c0_11] : memref<32x32xf32, #tpu.memory_space<vmem>>, vector<32x32xf32>
    %c0_12 = arith.constant 0 : index
    %c0_13 = arith.constant 0 : index
    %27 = vector.load %arg5[%c0_12, %c0_13] : memref<1x32xf32, #tpu.memory_space<vmem>>, vector<1x32xf32>
    %c0_14 = arith.constant 0 : index
    %c0_15 = arith.constant 0 : index
    %28 = vector.load %arg6[%c0_14, %c0_15] : memref<32x32xf32, #tpu.memory_space<vmem>>, vector<32x32xf32>
    %c0_16 = arith.constant 0 : index
    %c0_17 = arith.constant 0 : index
    %29 = vector.load %arg7[%c0_16, %c0_17] : memref<1x32xf32, #tpu.memory_space<vmem>>, vector<1x32xf32>
    %c0_18 = arith.constant 0 : index
    %c0_19 = arith.constant 0 : index
    %30 = vector.load %arg8[%c0_18, %c0_19] : memref<32x32xf32, #tpu.memory_space<vmem>>, vector<32x32xf32>
    %c0_20 = arith.constant 0 : index
    %c0_21 = arith.constant 0 : index
    %31 = vector.load %arg9[%c0_20, %c0_21] : memref<1x32xf32, #tpu.memory_space<vmem>>, vector<1x32xf32>
    %c0_22 = arith.constant 0 : index
    %c0_23 = arith.constant 0 : index
    %32 = vector.load %arg10[%c0_22, %c0_23] : memref<32x32xf32, #tpu.memory_space<vmem>>, vector<32x32xf32>
    %c0_24 = arith.constant 0 : index
    %c0_25 = arith.constant 0 : index
    %33 = vector.load %arg11[%c0_24, %c0_25] : memref<1x32xf32, #tpu.memory_space<vmem>>, vector<1x32xf32>
    %cst_26 = arith.constant dense<0.000000e+00> : vector<8x32xf32>
    %34 = tpu.matmul %25, %26, %cst_26 {dimension_numbers = #tpu.dot_dimension_numbers<[1], [0], [0], [1], [0, 0, 1, 1], [], []>} : vector<8x32xf32>, vector<32x32xf32>, vector<8x32xf32> -> vector<8x32xf32>
    %35 = vector.broadcast %27 : vector<1x32xf32> to vector<8x32xf32>
    %36 = arith.addf %34, %35 : vector<8x32xf32>
    %cst_27 = arith.constant dense<0.000000e+00> : vector<8x32xf32>
    %37 = tpu.matmul %25, %28, %cst_27 {dimension_numbers = #tpu.dot_dimension_numbers<[1], [0], [0], [1], [0, 0, 1, 1], [], []>} : vector<8x32xf32>, vector<32x32xf32>, vector<8x32xf32> -> vector<8x32xf32>
    %38 = vector.broadcast %29 : vector<1x32xf32> to vector<8x32xf32>
    %39 = arith.addf %37, %38 : vector<8x32xf32>
    %cst_28 = arith.constant dense<0.000000e+00> : vector<8x32xf32>
    %40 = tpu.matmul %25, %30, %cst_28 {dimension_numbers = #tpu.dot_dimension_numbers<[1], [0], [0], [1], [0, 0, 1, 1], [], []>} : vector<8x32xf32>, vector<32x32xf32>, vector<8x32xf32> -> vector<8x32xf32>
    %41 = vector.broadcast %31 : vector<1x32xf32> to vector<8x32xf32>
    %42 = arith.addf %40, %41 : vector<8x32xf32>
    %43 = tpu.iota {dimensions = array<i32: 0>} : vector<8x8xi32>
    %44 = tpu.iota {dimensions = array<i32: 1>} : vector<8x8xi32>
    %45 = arith.cmpi sle, %44, %43 : vector<8x8xi32>
    %cst_29 = arith.constant 0.000000e+00 : f32
    %46 = vector.broadcast %cst_29 : f32 to vector<8x32xf32>
    %47 = vector.extract_strided_slice %36 {offsets = [0, 0], sizes = [8, 8], strides = [1, 1]} : vector<8x32xf32> to vector<8x8xf32>
    %48 = vector.extract_strided_slice %39 {offsets = [0, 0], sizes = [8, 8], strides = [1, 1]} : vector<8x32xf32> to vector<8x8xf32>
    %49 = vector.extract_strided_slice %42 {offsets = [0, 0], sizes = [8, 8], strides = [1, 1]} : vector<8x32xf32> to vector<8x8xf32>
    %cst_30 = arith.constant dense<0.000000e+00> : vector<8x8xf32>
    %50 = tpu.matmul %47, %48, %cst_30 {dimension_numbers = #tpu.dot_dimension_numbers<[1], [1], [0], [0], [0, 0, 1, 0], [], []>} : vector<8x8xf32>, vector<8x8xf32>, vector<8x8xf32> -> vector<8x8xf32>
    %cst_31 = arith.constant 0.353553385 : f32
    %51 = vector.broadcast %cst_31 : f32 to vector<8x8xf32>
    %52 = arith.mulf %50, %51 : vector<8x8xf32>
    %cst_32 = arith.constant -1.000000e+30 : f32
    %53 = vector.broadcast %cst_32 : f32 to vector<8x8xf32>
    %54 = arith.select %45, %52, %53 : vector<8x8xi1>, vector<8x8xf32>
    %cst_33 = arith.constant dense<0xFF800000> : vector<8xf32>
    %55 = vector.multi_reduction <maximumf>, %54, %cst_33 [1] : vector<8x8xf32> to vector<8xf32>
    %56 = vector.shape_cast %55 : vector<8xf32> to vector<8x1xf32>
    %57 = vector.broadcast %56 : vector<8x1xf32> to vector<8x8xf32>
    %58 = arith.subf %54, %57 : vector<8x8xf32>
    %59 = math.exp %58 : vector<8x8xf32>
    %cst_34 = arith.constant dense<0.000000e+00> : vector<8xf32>
    %60 = vector.multi_reduction <add>, %59, %cst_34 [1] : vector<8x8xf32> to vector<8xf32>
    %61 = vector.shape_cast %60 : vector<8xf32> to vector<8x1xf32>
    %62 = vector.broadcast %61 : vector<8x1xf32> to vector<8x8xf32>
    %63 = arith.divf %59, %62 : vector<8x8xf32>
    %cst_35 = arith.constant dense<0.000000e+00> : vector<8x8xf32>
    %64 = tpu.matmul %63, %49, %cst_35 {dimension_numbers = #tpu.dot_dimension_numbers<[1], [0], [0], [1], [0, 0, 1, 1], [], []>} : vector<8x8xf32>, vector<8x8xf32>, vector<8x8xf32> -> vector<8x8xf32>
    %65 = vector.extract_strided_slice %32 {offsets = [0, 0], sizes = [8, 32], strides = [1, 1]} : vector<32x32xf32> to vector<8x32xf32>
    %cst_36 = arith.constant dense<0.000000e+00> : vector<8x32xf32>
    %66 = tpu.matmul %64, %65, %cst_36 {dimension_numbers = #tpu.dot_dimension_numbers<[1], [0], [0], [1], [0, 0, 1, 1], [], []>} : vector<8x8xf32>, vector<8x32xf32>, vector<8x32xf32> -> vector<8x32xf32>
    %67 = arith.addf %46, %66 : vector<8x32xf32>
    %68 = vector.extract_strided_slice %36 {offsets = [0, 8], sizes = [8, 8], strides = [1, 1]} : vector<8x32xf32> to vector<8x8xf32>
    %69 = vector.extract_strided_slice %39 {offsets = [0, 8], sizes = [8, 8], strides = [1, 1]} : vector<8x32xf32> to vector<8x8xf32>
    %70 = vector.extract_strided_slice %42 {offsets = [0, 8], sizes = [8, 8], strides = [1, 1]} : vector<8x32xf32> to vector<8x8xf32>
    %cst_37 = arith.constant dense<0.000000e+00> : vector<8x8xf32>
    %71 = tpu.matmul %68, %69, %cst_37 {dimension_numbers = #tpu.dot_dimension_numbers<[1], [1], [0], [0], [0, 0, 1, 0], [], []>} : vector<8x8xf32>, vector<8x8xf32>, vector<8x8xf32> -> vector<8x8xf32>
    %cst_38 = arith.constant 0.353553385 : f32
    %72 = vector.broadcast %cst_38 : f32 to vector<8x8xf32>
    %73 = arith.mulf %71, %72 : vector<8x8xf32>
    %cst_39 = arith.constant -1.000000e+30 : f32
    %74 = vector.broadcast %cst_39 : f32 to vector<8x8xf32>
    %75 = arith.select %45, %73, %74 : vector<8x8xi1>, vector<8x8xf32>
    %cst_40 = arith.constant dense<0xFF800000> : vector<8xf32>
    %76 = vector.multi_reduction <maximumf>, %75, %cst_40 [1] : vector<8x8xf32> to vector<8xf32>
    %77 = vector.shape_cast %76 : vector<8xf32> to vector<8x1xf32>
    %78 = vector.broadcast %77 : vector<8x1xf32> to vector<8x8xf32>
    %79 = arith.subf %75, %78 : vector<8x8xf32>
    %80 = math.exp %79 : vector<8x8xf32>
    %cst_41 = arith.constant dense<0.000000e+00> : vector<8xf32>
    %81 = vector.multi_reduction <add>, %80, %cst_41 [1] : vector<8x8xf32> to vector<8xf32>
    %82 = vector.shape_cast %81 : vector<8xf32> to vector<8x1xf32>
    %83 = vector.broadcast %82 : vector<8x1xf32> to vector<8x8xf32>
    %84 = arith.divf %80, %83 : vector<8x8xf32>
    %cst_42 = arith.constant dense<0.000000e+00> : vector<8x8xf32>
    %85 = tpu.matmul %84, %70, %cst_42 {dimension_numbers = #tpu.dot_dimension_numbers<[1], [0], [0], [1], [0, 0, 1, 1], [], []>} : vector<8x8xf32>, vector<8x8xf32>, vector<8x8xf32> -> vector<8x8xf32>
    %86 = vector.extract_strided_slice %32 {offsets = [8, 0], sizes = [8, 32], strides = [1, 1]} : vector<32x32xf32> to vector<8x32xf32>
    %cst_43 = arith.constant dense<0.000000e+00> : vector<8x32xf32>
    %87 = tpu.matmul %85, %86, %cst_43 {dimension_numbers = #tpu.dot_dimension_numbers<[1], [0], [0], [1], [0, 0, 1, 1], [], []>} : vector<8x8xf32>, vector<8x32xf32>, vector<8x32xf32> -> vector<8x32xf32>
    %88 = arith.addf %67, %87 : vector<8x32xf32>
    %89 = vector.extract_strided_slice %36 {offsets = [0, 16], sizes = [8, 8], strides = [1, 1]} : vector<8x32xf32> to vector<8x8xf32>
    %90 = vector.extract_strided_slice %39 {offsets = [0, 16], sizes = [8, 8], strides = [1, 1]} : vector<8x32xf32> to vector<8x8xf32>
    %91 = vector.extract_strided_slice %42 {offsets = [0, 16], sizes = [8, 8], strides = [1, 1]} : vector<8x32xf32> to vector<8x8xf32>
    %cst_44 = arith.constant dense<0.000000e+00> : vector<8x8xf32>
    %92 = tpu.matmul %89, %90, %cst_44 {dimension_numbers = #tpu.dot_dimension_numbers<[1], [1], [0], [0], [0, 0, 1, 0], [], []>} : vector<8x8xf32>, vector<8x8xf32>, vector<8x8xf32> -> vector<8x8xf32>
    %cst_45 = arith.constant 0.353553385 : f32
    %93 = vector.broadcast %cst_45 : f32 to vector<8x8xf32>
    %94 = arith.mulf %92, %93 : vector<8x8xf32>
    %cst_46 = arith.constant -1.000000e+30 : f32
    %95 = vector.broadcast %cst_46 : f32 to vector<8x8xf32>
    %96 = arith.select %45, %94, %95 : vector<8x8xi1>, vector<8x8xf32>
    %cst_47 = arith.constant dense<0xFF800000> : vector<8xf32>
    %97 = vector.multi_reduction <maximumf>, %96, %cst_47 [1] : vector<8x8xf32> to vector<8xf32>
    %98 = vector.shape_cast %97 : vector<8xf32> to vector<8x1xf32>
    %99 = vector.broadcast %98 : vector<8x1xf32> to vector<8x8xf32>
    %100 = arith.subf %96, %99 : vector<8x8xf32>
    %101 = math.exp %100 : vector<8x8xf32>
    %cst_48 = arith.constant dense<0.000000e+00> : vector<8xf32>
    %102 = vector.multi_reduction <add>, %101, %cst_48 [1] : vector<8x8xf32> to vector<8xf32>
    %103 = vector.shape_cast %102 : vector<8xf32> to vector<8x1xf32>
    %104 = vector.broadcast %103 : vector<8x1xf32> to vector<8x8xf32>
    %105 = arith.divf %101, %104 : vector<8x8xf32>
    %cst_49 = arith.constant dense<0.000000e+00> : vector<8x8xf32>
    %106 = tpu.matmul %105, %91, %cst_49 {dimension_numbers = #tpu.dot_dimension_numbers<[1], [0], [0], [1], [0, 0, 1, 1], [], []>} : vector<8x8xf32>, vector<8x8xf32>, vector<8x8xf32> -> vector<8x8xf32>
    %107 = vector.extract_strided_slice %32 {offsets = [16, 0], sizes = [8, 32], strides = [1, 1]} : vector<32x32xf32> to vector<8x32xf32>
    %cst_50 = arith.constant dense<0.000000e+00> : vector<8x32xf32>
    %108 = tpu.matmul %106, %107, %cst_50 {dimension_numbers = #tpu.dot_dimension_numbers<[1], [0], [0], [1], [0, 0, 1, 1], [], []>} : vector<8x8xf32>, vector<8x32xf32>, vector<8x32xf32> -> vector<8x32xf32>
    %109 = arith.addf %88, %108 : vector<8x32xf32>
    %110 = vector.extract_strided_slice %36 {offsets = [0, 24], sizes = [8, 8], strides = [1, 1]} : vector<8x32xf32> to vector<8x8xf32>
    %111 = vector.extract_strided_slice %39 {offsets = [0, 24], sizes = [8, 8], strides = [1, 1]} : vector<8x32xf32> to vector<8x8xf32>
    %112 = vector.extract_strided_slice %42 {offsets = [0, 24], sizes = [8, 8], strides = [1, 1]} : vector<8x32xf32> to vector<8x8xf32>
    %cst_51 = arith.constant dense<0.000000e+00> : vector<8x8xf32>
    %113 = tpu.matmul %110, %111, %cst_51 {dimension_numbers = #tpu.dot_dimension_numbers<[1], [1], [0], [0], [0, 0, 1, 0], [], []>} : vector<8x8xf32>, vector<8x8xf32>, vector<8x8xf32> -> vector<8x8xf32>
    %cst_52 = arith.constant 0.353553385 : f32
    %114 = vector.broadcast %cst_52 : f32 to vector<8x8xf32>
    %115 = arith.mulf %113, %114 : vector<8x8xf32>
    %cst_53 = arith.constant -1.000000e+30 : f32
    %116 = vector.broadcast %cst_53 : f32 to vector<8x8xf32>
    %117 = arith.select %45, %115, %116 : vector<8x8xi1>, vector<8x8xf32>
    %cst_54 = arith.constant dense<0xFF800000> : vector<8xf32>
    %118 = vector.multi_reduction <maximumf>, %117, %cst_54 [1] : vector<8x8xf32> to vector<8xf32>
    %119 = vector.shape_cast %118 : vector<8xf32> to vector<8x1xf32>
    %120 = vector.broadcast %119 : vector<8x1xf32> to vector<8x8xf32>
    %121 = arith.subf %117, %120 : vector<8x8xf32>
    %122 = math.exp %121 : vector<8x8xf32>
    %cst_55 = arith.constant dense<0.000000e+00> : vector<8xf32>
    %123 = vector.multi_reduction <add>, %122, %cst_55 [1] : vector<8x8xf32> to vector<8xf32>
    %124 = vector.shape_cast %123 : vector<8xf32> to vector<8x1xf32>
    %125 = vector.broadcast %124 : vector<8x1xf32> to vector<8x8xf32>
    %126 = arith.divf %122, %125 : vector<8x8xf32>
    %cst_56 = arith.constant dense<0.000000e+00> : vector<8x8xf32>
    %127 = tpu.matmul %126, %112, %cst_56 {dimension_numbers = #tpu.dot_dimension_numbers<[1], [0], [0], [1], [0, 0, 1, 1], [], []>} : vector<8x8xf32>, vector<8x8xf32>, vector<8x8xf32> -> vector<8x8xf32>
    %128 = vector.extract_strided_slice %32 {offsets = [24, 0], sizes = [8, 32], strides = [1, 1]} : vector<32x32xf32> to vector<8x32xf32>
    %cst_57 = arith.constant dense<0.000000e+00> : vector<8x32xf32>
    %129 = tpu.matmul %127, %128, %cst_57 {dimension_numbers = #tpu.dot_dimension_numbers<[1], [0], [0], [1], [0, 0, 1, 1], [], []>} : vector<8x8xf32>, vector<8x32xf32>, vector<8x32xf32> -> vector<8x32xf32>
    %130 = arith.addf %109, %129 : vector<8x32xf32>
    %131 = vector.broadcast %33 : vector<1x32xf32> to vector<8x32xf32>
    %132 = arith.addf %130, %131 : vector<8x32xf32>
    %133 = arith.addf %1, %132 : vector<8x32xf32>
    %c0_58 = arith.constant 0 : index
    %c0_59 = arith.constant 0 : index
    %c0_60 = arith.constant 0 : index
    %134 = vector.load %arg12[%c0_58, %c0_59, %c0_60] : memref<1x8x32xf32, #tpu.memory_space<vmem>>, vector<1x8x32xf32>
    %135 = vector.shape_cast %134 : vector<1x8x32xf32> to vector<8x32xf32>
    %136 = vector.shape_cast %133 : vector<8x32xf32> to vector<1x8x32xf32>
    tpu.vector_store %arg12[%c0_58, %c0_59, %c0_60], %136 {strides = array<i32>} : memref<1x8x32xf32, #tpu.memory_space<vmem>>, vector<1x8x32xf32>,
    return
  }
  func.func @transform_0(%arg0: i32) -> (i32, i32, i32) {
    %c0_i32 = arith.constant 0 : i32
    %c0_i32_0 = arith.constant 0 : i32
    %c0_i32_1 = arith.constant 0 : i32
    return %arg0, %c0_i32, %c0_i32_0 : i32, i32, i32
  }
  func.func @transform_1(%arg0: i32) -> (i32, i32) {
    %c0_i32 = arith.constant 0 : i32
    %c0_i32_0 = arith.constant 0 : i32
    %c0_i32_1 = arith.constant 0 : i32
    return %c0_i32, %c0_i32_0 : i32, i32
  }
  func.func @transform_2(%arg0: i32) -> (i32, i32) {
    %c0_i32 = arith.constant 0 : i32
    %c0_i32_0 = arith.constant 0 : i32
    %c0_i32_1 = arith.constant 0 : i32
    return %c0_i32, %c0_i32_0 : i32, i32
  }
  func.func @transform_3(%arg0: i32) -> (i32, i32) {
    %c0_i32 = arith.constant 0 : i32
    %c0_i32_0 = arith.constant 0 : i32
    %c0_i32_1 = arith.constant 0 : i32
    return %c0_i32, %c0_i32_0 : i32, i32
  }
  func.func @transform_4(%arg0: i32) -> (i32, i32) {
    %c0_i32 = arith.constant 0 : i32
    %c0_i32_0 = arith.constant 0 : i32
    %c0_i32_1 = arith.constant 0 : i32
    return %c0_i32, %c0_i32_0 : i32, i32
  }
  func.func @transform_5(%arg0: i32) -> (i32, i32) {
    %c0_i32 = arith.constant 0 : i32
    %c0_i32_0 = arith.constant 0 : i32
    %c0_i32_1 = arith.constant 0 : i32
    return %c0_i32, %c0_i32_0 : i32, i32
  }
  func.func @transform_6(%arg0: i32) -> (i32, i32) {
    %c0_i32 = arith.constant 0 : i32
    %c0_i32_0 = arith.constant 0 : i32
    %c0_i32_1 = arith.constant 0 : i32
    return %c0_i32, %c0_i32_0 : i32, i32
  }
  func.func @transform_7(%arg0: i32) -> (i32, i32) {
    %c0_i32 = arith.constant 0 : i32
    %c0_i32_0 = arith.constant 0 : i32
    %c0_i32_1 = arith.constant 0 : i32
    return %c0_i32, %c0_i32_0 : i32, i32
  }
  func.func @transform_8(%arg0: i32) -> (i32, i32) {
    %c0_i32 = arith.constant 0 : i32
    %c0_i32_0 = arith.constant 0 : i32
    %c0_i32_1 = arith.constant 0 : i32
    return %c0_i32, %c0_i32_0 : i32, i32
  }
  func.func @transform_9(%arg0: i32) -> (i32, i32) {
    %c0_i32 = arith.constant 0 : i32
    %c0_i32_0 = arith.constant 0 : i32
    %c0_i32_1 = arith.constant 0 : i32
    return %c0_i32, %c0_i32_0 : i32, i32
  }
  func.func @transform_10(%arg0: i32) -> (i32, i32) {
    %c0_i32 = arith.constant 0 : i32
    %c0_i32_0 = arith.constant 0 : i32
    %c0_i32_1 = arith.constant 0 : i32
    return %c0_i32, %c0_i32_0 : i32, i32
  }
  func.func @transform_11(%arg0: i32) -> (i32, i32, i32) {
    %c0_i32 = arith.constant 0 : i32
    %c0_i32_0 = arith.constant 0 : i32
    %c0_i32_1 = arith.constant 0 : i32
    return %arg0, %c0_i32, %c0_i32_0 : i32, i32, i32
  }
}

</mosaic_0001>

<bundles_post_ra>
// kernel: tpu_custom_call.1
= control target key start
LH: loop header
LB: loop body
LE: loop exit
PB: predicated region body
PF: predicated region fallthrough
CT: control target
= control target key end

     0   :  { %s3040_s0 = inlined_call_operand.hbm [shape: f32[8,8,32], index: 0, kind: input, shape index: {}]   ;;  %s3041_s1 = inlined_call_operand.vmem [shape: f32[1,32], index: 1, kind: input, shape index: {}]   ;;  %s3042_s2 = inlined_call_operand.vmem [shape: f32[1,32], index: 2, kind: input, shape index: {}]   ;;  %s3043_s3 = inlined_call_operand.hbm [shape: f32[32,32], index: 3, kind: input, shape index: {}]   ;;  %s3044_s4 = inlined_call_operand.hbm [shape: f32[1,32], index: 4, kind: input, shape index: {}]   ;;  %s3045_s5 = inlined_call_operand.hbm [shape: f32[32,32], index: 5, kind: input, shape index: {}]   ;;  %s3046_s6 = inlined_call_operand.hbm [shape: f32[1,32], index: 6, kind: input, shape index: {}]   ;;  %s3047_s7 = inlined_call_operand.hbm [shape: f32[32,32], index: 7, kind: input, shape index: {}]   ;;  %s3048_s8 = inlined_call_operand.hbm [shape: f32[1,32], index: 8, kind: input, shape index: {}]   ;;  %s3049_s9 = inlined_call_operand.vmem [shape: f32[32,32], index: 9, kind: input, shape index: {}]   ;;  %s3050_s10 = inlined_call_operand.vmem [shape: f32[1,32], index: 10, kind: input, shape index: {}]   ;;  %s3051_s11 = inlined_call_operand.hbm [shape: f32[8,8,32], index: 11, kind: output, shape index: {}]  }
   0x1   :  { %3057 = sst [smem:[#allocation20_spill]] %s3043_s3 }
   0x2   :  { %3058 = sst [smem:[#allocation21_spill]] %s3049_s9 }
   0x3   :  { %3059 = sst [smem:[#allocation22_spill]] %s3050_s10 }
   0x4   :  { %3060 = sst [smem:[#allocation23_spill]] %s3051_s11 }
   0x5   :  { %16 = vsyncpa [#allocation3], 0 }
   0x6   :  { %18 = vsyncpa [#allocation3 + $0x1], 0 }
   0x7   :  { %19 = vsyncpa [#allocation6], 0 }
   0x8   :  { %20 = vsyncpa [#allocation9], 0 }
   0x9   :  { %21 = vsyncpa [#allocation12], 0 }
   0xa   :  { %22 = vsyncpa [#allocation4], 0 }
   0xb   :  { %24 = vsyncpa [#allocation4 + $0x1], 0  ;;  %s2566_s17 = smov 0   ;;  %s2568_s18 = smov 0  }
   0xc   :  { %s2570_s19 = smov 0   ;;  %s2572_s20 = smov 0  }
   0xd LB: > { %s2490_s21 = smov [#allocation5]   ;;  %s2587_s23 = sadd.s32 4294967295, %s2488_s20   ;;  %s2488_s20 = sphi %s2572_s20, %s3086_s20   ;;  %s2484_s19 = sphi %s2570_s19, %s3085_s19   ;;  %s2480_s18 = sphi %s2568_s18, %s3084_s18   ;;  %s2476_s17 = sphi %s2566_s17, %s3083_s17  }
   0xe   : > { %s315_s22 = sshll.u32 %s2490_s21, 4  ;;  %p1881_p0 = scmp.ge.s32.totalorder %s2488_s20, 1  ;;  %s2592_s22 = int_to_ptr.vmem [resolvable:$true] %s315_s22 }
   0xf   : > { %p3054_p1 = scmp.eq.s32.totalorder %s2587_s23, 0  ;;  %p297_p2 = scmp.lt.s32.totalorder %s2488_s20, 9 }
  0x10   : > { %s2491_s25 = smov [#allocation8]   ;;  %s2492_s28 = smov [#allocation11]  }
  0x11   : > { %p2594_p3 = pnand %p1881_p0, %p297_p2  ;;  %s339_s26 = sshll.u32 %s2491_s25, 4  ;;  %s2606_s26 = int_to_ptr.vmem [resolvable:$true] %s339_s26 }
  0x12   : > { %s363_s29 = sshll.u32 %s2492_s28, 4  ;;  %s3063_s3 = sld [smem:[#allocation20_spill]]  ;;  %s2608_s29 = int_to_ptr.vmem [resolvable:$true] %s363_s29 }
  0x13   : > { %s3061_s24 = scalar_select %p2594_p3, 1, 0 }
  0x14   : > { %p2107_p4 = pneg %p2594_p3 }
  0x16   : > { %p2602_p5 = pnand %p2107_p4, %p3054_p1 }
  0x18   : > { %s2212_s13 = scalar_lea.hbm %s3063_s3, 512  ;;  %p2618_p7 = pneg %p2602_p5 }
  0x19   : > { %p2213_p6 = scmp.ne.s32.totalorder %s3063_s3, %s2212_s13  ;;  %p2219_p10 = scmp.lt.u32.totalorder %s2212_s13, %s3063_s3 }
  0x1b   : > { %p2215_p8 = pnand %p2618_p7, %p2213_p6 }
  0x1d   : > { %p2216_p9 = pneg %p2215_p8 }
  0x1f   : > { %p2221_p11 = pnand %p2219_p10, %p2216_p9 }
  0x21   : > { %2224 = shalt.err (!%p2221_p11)
}
  0x22   : > { %s2225_s28 = scalar_lea.vmem %s2592_s22, 512  ;;  %p2233_p2 = scmp.lt.s32.totalorder %s2592_s22, %s2592_s22 }
  0x23   : > { %p2226_p12 = scmp.ne.s32.totalorder %s2592_s22, %s2225_s28  ;;  %p2234_p4 = scmp.lt.s32.totalorder %s2225_s28, %s2225_s28 }
  0x25   : > { %p2228_p13 = pnand %p2226_p12, %p2618_p7  ;;  %p2235_p6 = por %p2234_p4, %p2233_p2 }
  0x27   : > { %p2229_p0 = pneg %p2228_p13 }
  0x29   : > { %p2236_p8 = pnand %p2235_p6, %p2229_p0 }
  0x2b   : > { %2239 = shalt.err (!%p2236_p8)
}
  0x2c   : > { %s2493_s30 = smov 128   ;;  %s2494_s12 = smov 8  }
  0x2d   : > { %2110 = dma.hbm_to_vmem [thread:$0]  (!%p2602_p5), %s3063_s3, 512, %s2592_s22, [#allocation6], %s2493_s30, %s2493_s30, %s2494_s12  }
  0x2e   : > { %s2240_s25 = scalar_lea.hbm %s3045_s5, 512 }
  0x2f   : > { %p2241_p9 = scmp.ne.s32.totalorder %s3045_s5, %s2240_s25  ;;  %p2247_p12 = scmp.lt.u32.totalorder %s2240_s25, %s3045_s5 }
  0x31   : > { %p2243_p10 = pnand %p2241_p9, %p2618_p7 }
  0x33   : > { %p2244_p11 = pneg %p2243_p10 }
  0x35   : > { %p2249_p13 = pnand %p2247_p12, %p2244_p11 }
  0x37   : > { %2252 = shalt.err (!%p2249_p13)
}
  0x38   : > { %s2253_s22 = scalar_lea.vmem %s2606_s26, 512  ;;  %p2261_p6 = scmp.lt.s32.totalorder %s2606_s26, %s2606_s26 }
  0x39   : > { %p2254_p0 = scmp.ne.s32.totalorder %s2606_s26, %s2253_s22  ;;  %p2262_p8 = scmp.lt.s32.totalorder %s2253_s22, %s2253_s22 }
  0x3b   : > { %p2256_p2 = pnand %p2254_p0, %p2618_p7  ;;  %p2263_p9 = por %p2262_p8, %p2261_p6 }
  0x3d   : > { %p2257_p4 = pneg %p2256_p2 }
  0x3f   : > { %p2264_p10 = pnand %p2263_p9, %p2257_p4 }
  0x41   : > { %2267 = shalt.err (!%p2264_p10)
}
  0x42   : > { %2116 = dma.hbm_to_vmem [thread:$0]  (!%p2602_p5), %s3045_s5, 512, %s2606_s26, [#allocation9], %s2493_s30, %s2493_s30, %s2494_s12  }
  0x43   : > { %s2268_s14 = scalar_lea.hbm %s3047_s7, 512 }
  0x44   : > { %p2269_p11 = scmp.ne.s32.totalorder %s3047_s7, %s2268_s14  ;;  %p2275_p0 = scmp.lt.u32.totalorder %s2268_s14, %s3047_s7 }
  0x46   : > { %p2271_p12 = pnand %p2269_p11, %p2618_p7 }
  0x48   : > { %p2272_p13 = pneg %p2271_p12 }
  0x4a   : > { %p2277_p2 = pnand %p2275_p0, %p2272_p13 }
  0x4c   : > { %2280 = shalt.err (!%p2277_p2)
}
  0x4d   : > { %s2281_s26 = scalar_lea.vmem %s2608_s29, 512  ;;  %p2289_p9 = scmp.lt.s32.totalorder %s2608_s29, %s2608_s29 }
  0x4e   : > { %p2282_p4 = scmp.ne.s32.totalorder %s2608_s29, %s2281_s26  ;;  %p2290_p10 = scmp.lt.s32.totalorder %s2281_s26, %s2281_s26 }
  0x50   : > { %p2284_p6 = pnand %p2282_p4, %p2618_p7  ;;  %p2291_p11 = por %p2290_p10, %p2289_p9 }
  0x52   : > { %p2285_p8 = pneg %p2284_p6 }
  0x54   : > { %p2292_p12 = pnand %p2291_p11, %p2285_p8 }
  0x56   : > { %2295 = shalt.err (!%p2292_p12)
}
  0x57   : > { %2122 = dma.hbm_to_vmem [thread:$0]  (!%p2602_p5), %s3047_s7, 512, %s2608_s29, [#allocation12], %s2493_s30, %s2493_s30, %s2494_s12  }
  0x58   : > { %s2495_s10 = smov [#allocation7]   ;;  %s2496_s13 = smov [#allocation10]  }
  0x59   : > { %s329_s11 = sshll.u32 %s2495_s10, 4  ;;  %s353_s14 = sshll.u32 %s2496_s13, 4  ;;  %s330_s11 = int_to_ptr.vmem [resolvable:$true] %s329_s11  ;;  %s354_s14 = int_to_ptr.vmem [resolvable:$true] %s353_s14 }
  0x5a   : > { %s2296_s25 = scalar_lea.hbm %s3044_s4, 16 }
  0x5b   : > { %p2297_p13 = scmp.ne.s32.totalorder %s3044_s4, %s2296_s25  ;;  %p2303_p4 = scmp.lt.u32.totalorder %s2296_s25, %s3044_s4 }
  0x5d   : > { %p2299_p0 = pnand %p2297_p13, %p2618_p7 }
  0x5f   : > { %p2300_p2 = pneg %p2299_p0 }
  0x61   : > { %p2305_p6 = pnand %p2303_p4, %p2300_p2 }
  0x63   : > { %2308 = shalt.err (!%p2305_p6)
}
  0x64   : > { %s2309_s29 = scalar_lea.vmem %s330_s11, 16  ;;  %s2316_s30 = scalar_lea.vmem %s330_s11, 32 }
  0x65   : > { %p2310_p8 = scmp.ne.s32.totalorder %s330_s11, %s2309_s29  ;;  %p2317_p11 = scmp.lt.s32.totalorder %s330_s11, %s330_s11 }
  0x66   : > { %p2318_p12 = scmp.lt.s32.totalorder %s2316_s30, %s2309_s29 }
  0x67   : > { %p2312_p9 = pnand %p2310_p8, %p2618_p7 }
  0x68   : > { %p2319_p1 = por %p2318_p12, %p2317_p11 }
  0x69   : > { %p2313_p10 = pneg %p2312_p9 }
  0x6b   : > { %p2320_p3 = pnand %p2319_p1, %p2313_p10 }
  0x6d   : > { %2323 = shalt.err (!%p2320_p3)
}
  0x6e   : > { %2113 = dma.hbm_to_vmem [thread:$0]  (!%p2602_p5), %s3044_s4, 16, %s330_s11, [#allocation6]  }
  0x6f   : > { %s2324_s13 = scalar_lea.hbm %s3046_s6, 16 }
  0x70   : > { %p2325_p13 = scmp.ne.s32.totalorder %s3046_s6, %s2324_s13  ;;  %p2331_p3 = scmp.lt.u32.totalorder %s2324_s13, %s3046_s6 }
  0x72   : > { %p2327_p0 = pnand %p2325_p13, %p2618_p7 }
  0x74   : > { %p2328_p1 = pneg %p2327_p0 }
  0x76   : > { %p2333_p2 = pnand %p2331_p3, %p2328_p1 }
  0x78   : > { %2336 = shalt.err (!%p2333_p2)
}
  0x79   : > { %s2337_s26 = scalar_lea.vmem %s354_s14, 16  ;;  %s2344_s11 = scalar_lea.vmem %s354_s14, 32 }
  0x7a   : > { %p2338_p4 = scmp.ne.s32.totalorder %s354_s14, %s2337_s26  ;;  %p2345_p9 = scmp.lt.s32.totalorder %s354_s14, %s354_s14 }
  0x7b   : > { %p2346_p10 = scmp.lt.s32.totalorder %s2344_s11, %s2337_s26 }
  0x7c   : > { %p2340_p6 = pnand %p2338_p4, %p2618_p7 }
  0x7d   : > { %p2347_p11 = por %p2346_p10, %p2345_p9 }
  0x7e   : > { %p2341_p8 = pneg %p2340_p6 }
  0x80   : > { %p2348_p12 = pnand %p2347_p11, %p2341_p8 }
  0x82   : > { %2351 = shalt.err (!%p2348_p12)
}
  0x83   : > { %2119 = dma.hbm_to_vmem [thread:$0]  (!%p2602_p5), %s3046_s6, 16, %s354_s14, [#allocation9]  }
  0x84   : > { %s2497_s30 = smov [#allocation13]   ;;  %s2352_s10 = scalar_lea.hbm %s3048_s8, 16 }
  0x85   : > { %s377_s12 = sshll.u32 %s2497_s30, 4  ;;  %p2353_p13 = scmp.ne.s32.totalorder %s3048_s8, %s2352_s10  ;;  %s378_s12 = int_to_ptr.vmem [resolvable:$true] %s377_s12 }
  0x86   : > { %p2359_p3 = scmp.lt.u32.totalorder %s2352_s10, %s3048_s8 }
  0x87   : > { %p2355_p0 = pnand %p2353_p13, %p2618_p7 }
  0x89   : > { %p2356_p1 = pneg %p2355_p0 }
  0x8b   : > { %p2361_p2 = pnand %p2359_p3, %p2356_p1 }
  0x8d   : > { %2364 = shalt.err (!%p2361_p2)
}
  0x8e   : > { %s2365_s14 = scalar_lea.vmem %s378_s12, 16  ;;  %s2372_s28 = scalar_lea.vmem %s378_s12, 32 }
  0x8f   : > { %p2366_p4 = scmp.ne.s32.totalorder %s378_s12, %s2365_s14  ;;  %p2373_p9 = scmp.lt.s32.totalorder %s378_s12, %s378_s12 }
  0x90   : > { %p2374_p10 = scmp.lt.s32.totalorder %s2372_s28, %s2365_s14 }
  0x91   : > { %p2368_p6 = pnand %p2366_p4, %p2618_p7 }
  0x92   : > { %p2375_p11 = por %p2374_p10, %p2373_p9 }
  0x93   : > { %p2369_p8 = pneg %p2368_p6 }
  0x95   : > { %p2376_p12 = pnand %p2375_p11, %p2369_p8 }
  0x97   : > { %2379 = shalt.err (!%p2376_p12)
}
  0x98   : > { %2125 = dma.hbm_to_vmem [thread:$0]  (!%p2602_p5), %s3048_s8, 16, %s378_s12, [#allocation12]  }
  0x99   : > { %s1880_s16 = sadd.s32 4294967294, %s2488_s20   ;;  %s2750_s27 = sadd.s32 1, %s2488_s20  }
  0x9a   : > { %s34_s22 = ssub.s32 %s2488_s20, %s2750_s27  ;;  %s37_s29 = sadd.s32 1, %s2484_s19 }
  0x9b   : > { %p35_p7 = scmp.eq.s32.totalorder %s34_s22, 0  ;;  %p44_p13 = scmp.ne.s32.totalorder %s2484_s19, %s2480_s18 }
  0x9c   : > { %p45_p0 = scmp.eq.s32.totalorder %s2488_s20, 0  ;;  %p50_p1 = scmp.ne.s32.totalorder %s2480_s18, %s2476_s17 }
  0x9d   : > { %s2761_s30 = scalar_select %p35_p7, %s2484_s19, %s37_s29  }
  0x9e   : > { %p2763_p3 = por %p45_p0, %p44_p13  ;;  %p3066_p2 = scmp.eq.s32.totalorder %s2587_s23, 0 }
  0x9f   : > { %p284_p4 = scmp.eq.s32.totalorder %s2587_s23, 7  ;;  %p290_p6 = scmp.eq.s32.totalorder %s1880_s16, 7 }
  0xa0   : > { %p2769_p5 = por %p3066_p2, %p50_p1  ;;  %p2140_p8 = scmp.lt.s32.totalorder %s2488_s20, 8 }
  0xa1   : > { %s394_s3 = sand.u32 1, %s2484_s19   ;;  %p2776_p9 = por %p284_p4, %p44_p13 }
  0xa2   : > { %p2780_p10 = por %p290_p6, %p50_p1  ;;  %s1889_s15 = sshll.u32 %s394_s3, 3 }
  0xa3   : > { %s3068_s10 = scalar_select %p2776_p9, 1, 0 }
  0xa4   : > { %s3069_s13 = scalar_select %p2780_p10, 1, 0 }
  0xa5   : > { %s1890_s21 = sshll.u32 %s2488_s20, 7  ;;  %s398_s26 = scalar_lea.vmem [#allocation2], %s1889_s15 }
  0xa6   : > { %s2788_s28 = scalar_lea.hbm %s3040_s0, %s1890_s21  ;;  %s405_s11 = sshll.u32 %s398_s26, 4  ;;  %s2790_s11 = int_to_ptr.vmem [resolvable:$true] %s405_s11 }
  0xa7   : > { %p2794_p11 = pnand %p2140_p8, %p2763_p3  ;;  %s395_s22 = scalar_lea.sflag [#allocation3], %s394_s3 }
  0xa8   : > { %s2380_s29 = scalar_lea.hbm %s2788_s28, 128  ;;  %s2385_s25 = scalar_lea.hbm %s3040_s0, 1024 }
  0xa9   : > { %p2381_p12 = scmp.ne.s32.totalorder %s2788_s28, %s2380_s29  ;;  %p2382_p7 = pneg %p2794_p11 }
  0xaa   : > { %p2386_p1 = scmp.lt.u32.totalorder %s2788_s28, %s3040_s0  ;;  %p2387_p3 = scmp.lt.u32.totalorder %s2385_s25, %s2380_s29 }
  0xab   : > { %p2383_p13 = pnand %p2382_p7, %p2381_p12  ;;  %p2389_p4 = scmp.lt.u32.totalorder %s2380_s29, %s2788_s28 }
  0xac   : > { %p2388_p2 = por %p2387_p3, %p2386_p1 }
  0xad   : > { %p2384_p0 = pneg %p2383_p13 }
  0xae   : > { %p2390_p6 = por %p2389_p4, %p2388_p2 }
  0xb0   : > { %p2391_p8 = pnand %p2390_p6, %p2384_p0 }
  0xb2   : > { %2394 = shalt.err (!%p2391_p8)
}
  0xb3   : > { %s2395_s3 = scalar_lea.vmem %s2790_s11, 128  ;;  %s2498_s26 = smov [#allocation2]  }
  0xb4   : > { %p2396_p12 = scmp.ne.s32.totalorder %s2790_s11, %s2395_s3  ;;  %s2400_s15 = sshll.u32 %s2498_s26, 4  ;;  %s2401_s15 = int_to_ptr.vmem [resolvable:$false] %s2400_s15 }
  0xb5   : > { %s2402_s21 = scalar_lea.vmem %s2401_s15, 256  ;;  %p2403_p9 = scmp.lt.s32.totalorder %s2790_s11, %s2401_s15 }
  0xb6   : > { %p2398_p13 = pnand %p2396_p12, %p2382_p7  ;;  %p2404_p1 = scmp.lt.s32.totalorder %s2402_s21, %s2395_s3 }
  0xb8   : > { %p2399_p10 = pneg %p2398_p13  ;;  %p2405_p3 = por %p2404_p1, %p2403_p9 }
  0xba   : > { %p2406_p2 = pnand %p2405_p3, %p2399_p10 }
  0xbc   : > { %2409 = shalt.err (!%p2406_p2)
}
  0xbd   : > { %2129 = dma.hbm_to_vmem [thread:$0]  (!%p2794_p11), %s2788_s28, 128, %s2790_s11, %s395_s22  }
  0xbe   : > { %p3071_p0 = scmp.ne.s32.totalorder %s3061_s24, 0 }
  0xbf   : > { %s2826_s29 = sand.u32 (!%p3071_p0), 1, %s2480_s18  }
  0xc0   : > { %414 = sbr.rel (%p3071_p0) target bundleno = 3108 (0xc24), region = 64  ;;  %s1892_s25 = sshll.u32 (!%p3071_p0), %s2826_s29, 3 }
  0xc1   : > { %s417_s9 = scalar_lea.sflag (!%p3071_p0), [#allocation3], %s2826_s29  ;;  %s420_s14 = scalar_lea.vmem (!%p3071_p0), [#allocation2], %s1892_s25 }
  0xc7   : > { %2455 = dma.done.wait (%p2769_p5), %s417_s9, 128  }
  0xc8   : > { %2457 = vsyncadd (%p2769_p5), %s417_s9, 4294967168  ;;  %p3072_p9 = scmp.eq.s32.totalorder %s2587_s23, 0 }
  0xca   : > { %2459 = dma.done.wait (%p3072_p9), [#allocation6], 528   ;;  %p3073_p10 = pmov %p3072_p9 }
  0xcb   : > { %p3074_p11 = pmov %p3072_p9 }
  0xcc   : > { %2461 = vsyncadd (%p3073_p10), [#allocation6], 4294966768 }
  0xcd   : > { %2463 = dma.done.wait (%p3074_p11), [#allocation9], 528   ;;  %p3075_p7 = pmov %p3072_p9 }
  0xcf   : > { %2465 = vsyncadd (%p3075_p7), [#allocation9], 4294966768  ;;  %p3076_p4 = pmov %p3075_p7 }
  0xd1   : > { %2467 = dma.done.wait (%p3076_p4), [#allocation12], 528   ;;  %p3077_p6 = pmov %p3076_p4 }
  0xd2   : > { %vm486_vm0 = vcmask 261120   ;;  %v2848_v0 = vld [vmem:[%s420_s14] sm:$0xff]  ;;  %v515_v7 = vld [vmem:[#allocation5] sm:$0xff]  ;;  %v516_v8 = vld [vmem:[#allocation5 + $0x8] sm:$0xff]  ;;  %v2499_v10 = vmov 0.0|0.0   ;;  %vm2500_vm1 = vmmov 0   ;;  %v766_v50 = vlaneseq }
  0xd3   : > { %2469 = vsyncadd (%p3077_p6), [#allocation12], 4294966768  ;;  %v487_v1 = vsel %vm486_vm0, %v2848_v0, 0.0  ;;  %v520_v9 = vld [vmem:[#allocation8] sm:$0xff]  ;;  %2061 = vmatprep.subr.bf16.mxu0 %v2499_v10  ;;  %v2062_v11 = vpack.c.bf16 %v516_v8, %v515_v7  ;;  %2067 = vmatprep.subr.bf16.mxu1 %v2499_v10  ;;  %v521_v12 = vld [vmem:[#allocation8 + $0x8] sm:$0xff]  ;;  %v2501_v18 = vmov 0.0  }
  0xd4   : > { %488 = vadd.xlane.f32.xlu0 %v487_v1  ;;  %v517_v13 = vld [vmem:[#allocation5 + $0x10] sm:$0xff]  ;;  %v518_v14 = vld [vmem:[#allocation5 + $0x18] sm:$0xff]  ;;  %v2068_v15 = vpack.c.bf16 %v521_v12, %v520_v9  ;;  %1976 = vmatprep.mubr.msk.f32.mxu0 %vm2500_vm1, %v2501_v18  ;;  %v525_v27 = vld [vmem:[#allocation11] sm:$0xff]  ;;  %vm771_vm2 = vcmask 64512   ;;  %s2502_s16 = smov 120   ;;  %v2899_v51 = vshrl.u32 %v766_v50, 7 }
  0xd5   : > { %v522_v16 = vld [vmem:[#allocation8 + $0x10] sm:$0xff]  ;;  %v523_v17 = vld [vmem:[#allocation8 + $0x18] sm:$0xff]  ;;  %1987 = vmatprep.mubr.msk.f32.mxu1 %vm2500_vm1, %v2501_v18  ;;  %2063 = vmatpush3.bf16.msra.mxu0 %v2062_v11  ;;  %v2065_v19 = vpack.c.bf16 %v518_v14, %v517_v13  ;;  %v1900_v25 = vld [vmem:[%s3041_s1] ss:$0 sm:$0xff]  ;;  %v2901_v52 = vand.u32 127, %v766_v50  ;;  %s2503_s22 = smov 112  }
  0xd6   : > { %2069 = vmatpush3.bf16.msra.mxu1 %v2068_v15  ;;  %2064 = vmatprep.subr.bf16.mxu0 %v2499_v10  ;;  %v2071_v20 = vpack.c.bf16 %v523_v17, %v522_v16  ;;  %v526_v28 = vld [vmem:[#allocation11 + $0x8] sm:$0xff]  ;;  %v527_v33 = vld [vmem:[#allocation11 + $0x10] sm:$0xff]  ;;  %v528_v34 = vld [vmem:[#allocation11 + $0x18] sm:$0xff]  ;;  %s3078_s15 = sld [smem:[#allocation21_spill]]  ;;  %s2504_s14 = smov 104  }
  0xd7   : > { %2070 = vmatprep.subr.bf16.mxu1 %v2499_v10  ;;  %v1901_v29 = vld [vmem:[%s3042_s2] ss:$0 sm:$0xff]  ;;  %v2074_v31 = vpack.c.bf16 %v526_v28, %v525_v27  ;;  %v2077_v35 = vpack.c.bf16 %v528_v34, %v527_v33  ;;  %v1904_v36 = vld [vmem:[#allocation10] ss:$0 sm:$0xff]  ;;  %v1902_v39 = vld [vmem:[#allocation7] ss:$0 sm:$0xff]  ;;  %vm770_vm3 = vcmp.le.s32.totalorder %v2901_v52, %v2899_v51 }
  0xd8   : > { %v1906_v44 = vld [vmem:[#allocation13] ss:$0 sm:$0xff]  ;;  %s3079_s3 = sld [smem:[#allocation22_spill]]  ;;  %s1926_s26 = sshll.u32 %s2587_s23, 7 }
  0xd9   : > { %2066 = vmatpush3.bf16.msra.mxu0 %v2065_v19  ;;  %s482_s21 = scalar_lea.vmem [#allocation14], %s1892_s25  ;;  %s3080_s12 = sld [smem:[#allocation23_spill]] }
  0xda   : > { %2072 = vmatpush3.bf16.msra.mxu1 %v2071_v20  ;;  %2073 = vmatprep.subr.bf16.mxu0 %v2499_v10  ;;  %s1753_s9 = sshll.u32 %s482_s21, 4  ;;  %s1740_s11 = scalar_lea.sflag [#allocation4], %s2826_s29  ;;  %s2998_s9 = int_to_ptr.vmem [resolvable:$true] %s1753_s9 }
  0xdb   : > { %2001 = vmatprep.subr.mxu1 %v2501_v18  ;;  %s2410_s23 = scalar_lea.vmem %s2998_s9, 128  ;;  %p3081_p8 = scmp.ne.s32.totalorder %s3068_s10, 0 }
  0xdc   : > { %v531_v13 = vld [vmem:[%s3078_s15 + $0x8] sm:$0xff]  ;;  %v530_v19 = vld [vmem:[%s3078_s15] sm:$0xff]  ;;  %v533_v51 = vld [vmem:[%s3078_s15 + $0x18] sm:$0xff]  ;;  %p2411_p5 = scmp.ne.s32.totalorder %s2998_s9, %s2410_s23  ;;  %s2505_s25 = smov [#allocation14]  }
  0xde   : > { %p2412_p12 = pnand %p2411_p5, %p3081_p8 }
  0xdf   : > { %s2996_s28 = scalar_lea.hbm %s3080_s12, %s1926_s26 }
  0xe0   : > { %p2413_p13 = pneg %p2412_p12 }
 0x161   : > { %v489_v2 = vpop.xlane.xlu0 %488 }
 0x162   : > { %v491_v3 = vmul.f32 0.03125, %v489_v2 }
 0x164   : > { %v492_v4 = vsub.f32 %v2848_v0, %v491_v3 }
 0x166   : > { %v493_v5 = vmul.f32 %v492_v4, %v492_v4 }
 0x168   : > { %v494_v6 = vsel %vm486_vm0, %v493_v5, 0.0 }
 0x169   : > { %495 = vadd.xlane.f32.xlu0 %v494_v6 }
 0x1f6   : > { %v496_v21 = vpop.xlane.xlu0 %495 }
 0x1f7   : > { %v497_v22 = vmul.f32 0.03125, %v496_v21 }
 0x1f9   : > { %v498_v23 = vadd.f32 1e-05, %v497_v22 }
 0x1fb   : > { %2194 = vrsqrt.f32 %v498_v23 }
 0x205   : > { %v2195_v24 = vpop.eup %2194 }
 0x206   : > { %v500_v26 = vmul.f32 %v2195_v24, %v492_v4 }
 0x208   : > { %v507_v30 = vmul.f32 %v1900_v25, %v500_v26 }
 0x20a   : > { %v514_v32 = vadd.f32 %v1901_v29, %v507_v30 }
 0x20c   : > { %1977 = vmatmul.mubr.msk.f32.vlgmr.msra.gmra.mrb[0].mxu0 %vm486_vm0, %v514_v32  ;;  %1988 = vmatmul.mubr.msk.f32.vlgmr.msra.gmra.mrb[0].mxu1 %vm486_vm0, %v514_v32 }
 0x20d   : > { %2075 = vmatpush3.bf16.msra.mxu0 %v2074_v31  ;;  %1998 = vmatprep.mubr.msk.f32.mxu0 %vm2500_vm1, %v2501_v18 }
 0x20e   : > { %2076 = vmatprep.subr.bf16.mxu0 %v2499_v10  ;;  %2003 = vmatprep.mubr.msk.f32.mxu1 %vm2500_vm1, %v2501_v18 }
 0x211   : > { %2078 = vmatpush3.bf16.msra.mxu0 %v2077_v35 }
 0x212   : > { %2011 = vmatprep.subr.mxu0 %v2501_v18 }
 0x214   : > { %1999 = vmatmul.mubr.msk.f32.vlgmr.msra.gmra.mrb[2].mxu0 %vm486_vm0, %v514_v32 }
 0x215   : > { %2013 = vmatprep.mubr.msk.f32.mxu0 %vm2500_vm1, %v2501_v18 }
 0x2df   : > { %v610_v37 = vpop.f32.mrb[0].mxu0  ;;  %v686_v38 = vpop.f32.mrb[0].mxu1 }
 0x2e0   : > { %v2875_v40 = vadd.f32 %v1904_v36, %v686_v38  ;;  %v1978_v41 = vpop.f32.mrb[1].mxu0  ;;  %v1989_v42 = vpop.f32.mrb[1].mxu1  ;;  %v2881_v43 = vadd.f32 %v1902_v39, %v610_v37 }
 0x2e2   : > { %936 = vrot.lane.b32.xlu1 %v2875_v40, %s2502_s16  ;;  %2002 = vmatpush3.xpose.msk.msra.mxu1 %vm771_vm2, %v2875_v40 }
 0x2e3   : > { %2006 = vmatprep.subr.mxu1 %v2501_v18 }
 0x2e5   : > { %2004 = vmatmul.mubr.msk.f32.vlgmr.msra.gmra.mrb[2].mxu1 %vm771_vm2, %v2881_v43 }
 0x2e6   : > { %934 = vrot.lane.b32.xlu1 %v2881_v43, %s2502_s16  ;;  %2008 = vmatprep.mubr.msk.f32.mxu1 %vm2500_vm1, %v2501_v18 }
 0x2e7   : > { %v762_v45 = vpop.f32.mrb[2].mxu0 }
 0x2e8   : > { %v2890_v46 = vadd.f32 %v1906_v44, %v762_v45  ;;  %v2000_v47 = vpop.f32.mrb[3].mxu0 }
 0x2ea   : > { %2007 = vmatpush3.msra.mxu1 %v2890_v46 }
 0x2eb   : > { %2016 = vmatprep.subr.mxu1 %v2501_v18 }
 0x354   : > { %v937_v48 = vpop.permute.xlu1 %936 }
 0x355   : > { %2012 = vmatpush3.xpose.msk.msra.mxu0 %vm771_vm2, %v937_v48 }
 0x356   : > { %2021 = vmatprep.subr.mxu0 %v2501_v18 }
 0x358   : > { %v935_v49 = vpop.permute.xlu1 %934 }
 0x359   : > { %2014 = vmatmul.mubr.msk.f32.vlgmr.msra.gmra.mrb[4].mxu0 %vm771_vm2, %v935_v49 }
 0x35a   : > { %2023 = vmatprep.mubr.msk.f32.mxu0 %vm2500_vm1, %v2501_v18  ;;  %2022 = vmatpush3.msra.mxu0 %v531_v13 }
 0x35b   : > { %2031 = vmatprep.subr.mxu0 %v2501_v18 }
 0x3b8   : > { %v844_v53 = vpop.f32.mrb[2].mxu1 }
 0x3b9   : > { %v848_v54 = vmul.f32 0.35355338, %v844_v53  ;;  %v2005_v55 = vpop.f32.mrb[3].mxu1 }
 0x3bb   : > { %v849_v56 = vsel %vm770_vm3, %v848_v54, -1e+30 }
 0x3bc   : > { %v850_v57 = vsel %vm771_vm2, %v849_v56, -inf }
 0x3bd   : > { %851 = vmax.xlane.f32.xlu0 %v850_v57 }
 0x42c   : > { %v1008_v58 = vpop.f32.mrb[4].mxu0 }
 0x42d   : > { %v1012_v59 = vmul.f32 0.35355338, %v1008_v58  ;;  %v2015_v60 = vpop.f32.mrb[5].mxu0 }
 0x42f   : > { %v1013_v61 = vsel %vm770_vm3, %v1012_v59, -1e+30 }
 0x430   : > { %v1014_v62 = vsel %vm771_vm2, %v1013_v61, -inf }
 0x431   : > { %1015 = vmax.xlane.f32.xlu1 %v1014_v62 }
 0x442   : > { %1248 = vrot.lane.b32.xlu1 %v2881_v43, %s2503_s22 }
 0x44a   : > { %v852_v63 = vpop.xlane.xlu0 %851 }
 0x44b   : > { %v853_v1 = vsub.f32 %v849_v56, %v852_v63 }
 0x44d   : > { %v854_v2 = vmul.f32 1.442695, %v853_v1 }
 0x44f   : > { %2196 = vpow2.f32 %v854_v2 }
 0x459   : > { %v2197_v3 = vpop.eup %2196 }
 0x45a   : > { %v856_v4 = vsel %vm771_vm2, %v2197_v3, 0.0 }
 0x45b   : > { %857 = vadd.xlane.f32.xlu0 %v856_v4 }
 0x4be   : > { %v1016_v5 = vpop.xlane.xlu1 %1015 }
 0x4bf   : > { %v1017_v6 = vsub.f32 %v1013_v61, %v1016_v5 }
 0x4c1   : > { %v1018_v7 = vmul.f32 1.442695, %v1017_v6  ;;  %v1924_v6 = vld [vmem:[%s3079_s3] ss:$0 sm:$0xff] }
 0x4c2   : > { %v1249_v25 = vpop.permute.xlu1 %1248 }
 0x4c3   : > { %2198 = vpow2.f32 %v1018_v7 }
 0x4cd   : > { %v2199_v8 = vpop.eup %2198 }
 0x4ce   : > { %v1020_v9 = vsel %vm771_vm2, %v2199_v8, 0.0 }
 0x4cf   : > { %1021 = vadd.xlane.f32.xlu0 %v1020_v9 }
 0x4e5   : > { %1026 = vrot.lane.b32.xlu0 %v2890_v46, %s2502_s16  ;;  %s2414_s16 = sshll.u32 %s2505_s25, 4  ;;  %s2415_s16 = int_to_ptr.vmem [resolvable:$false] %s2414_s16 }
 0x4e6   : > { %p2417_p1 = scmp.lt.s32.totalorder %s2998_s9, %s2415_s16 }
 0x4e8   : > { %v858_v10 = vpop.xlane.xlu0 %857 }
 0x4e9   : > { %2200 = vrcp.f32 %v858_v10  ;;  %1250 = vrot.lane.b32.xlu0 %v2875_v40, %s2503_s22 }
 0x4f3   : > { %v2201_v11 = vpop.eup %2200 }
 0x4f4   : > { %v860_v12 = vmul.f32 %v2201_v11, %v2197_v3 }
 0x4f6   : > { %2009 = vmatmul.mubr.msk.f32.vlgmr.msra.gmra.mrb[4].mxu1 %vm771_vm2, %v860_v12 }
 0x4f7   : > { %2018 = vmatprep.mubr.msk.f32.mxu1 %vm2500_vm1, %v2501_v18 }
 0x55c   : > { %v1022_v14 = vpop.xlane.xlu0 %1021 }
 0x55d   : > { %2202 = vrcp.f32 %v1022_v14 }
 0x560   : > { %v1027_v15 = vpop.permute.xlu0 %1026 }
 0x561   : > { %2017 = vmatpush3.msra.mxu1 %v1027_v15 }
 0x562   : > { %2026 = vmatprep.subr.mxu1 %v2501_v18 }
 0x564   : > { %v1251_v23 = vpop.permute.xlu0 %1250 }
 0x567   : > { %v2203_v16 = vpop.eup %2202 }
 0x568   : > { %v1024_v17 = vmul.f32 %v2203_v16, %v2199_v8 }
 0x56a   : > { %2019 = vmatmul.mubr.msk.f32.vlgmr.msra.gmra.mrb[6].mxu1 %vm771_vm2, %v1024_v17 }
 0x56b   : > { %2027 = vmatpush3.msra.mxu1 %v530_v19  ;;  %2028 = vmatprep.mubr.msk.f32.mxu1 %vm2500_vm1, %v2501_v18 }
 0x56c   : > { %2036 = vmatprep.subr.mxu1 %v2501_v18 }
 0x5c9   : > { %v930_v20 = vpop.f32.mrb[4].mxu1 }
 0x5ca   : > { %v2010_v21 = vpop.f32.mrb[5].mxu1  ;;  %2029 = vmatmul.mubr.msk.f32.vlgmr.msra.gmra.mrb[8].mxu1 %vm771_vm2, %v930_v20 }
 0x5cb   : > { %2038 = vmatprep.mubr.msk.f32.mxu1 %vm2500_vm1, %v2501_v18 }
 0x63d   : > { %v1098_v22 = vpop.f32.mrb[6].mxu1 }
 0x63e   : > { %v2020_v24 = vpop.f32.mrb[7].mxu1  ;;  %2024 = vmatmul.mubr.msk.f32.vlgmr.msra.gmra.mrb[6].mxu0 %vm771_vm2, %v1098_v22 }
 0x63f   : > { %2032 = vmatpush3.xpose.msk.msra.mxu0 %vm771_vm2, %v1251_v23  ;;  %2033 = vmatprep.mubr.msk.f32.mxu0 %vm2500_vm1, %v2501_v18 }
 0x640   : > { %2041 = vmatprep.subr.mxu0 %v2501_v18 }
 0x642   : > { %2034 = vmatmul.mubr.msk.f32.vlgmr.msra.gmra.mrb[8].mxu0 %vm771_vm2, %v1249_v25 }
 0x643   : > { %2043 = vmatprep.mubr.msk.f32.mxu0 %vm2500_vm1, %v2501_v18 }
 0x69d   : > { %v1244_v26 = vpop.f32.mrb[8].mxu1 }
 0x69e   : > { %v2030_v27 = vpop.f32.mrb[9].mxu1 }
 0x711   : > { %v1171_v28 = vpop.f32.mrb[6].mxu0 }
 0x712   : > { %v1245_v29 = vadd.f32 %v1244_v26, %v1171_v28  ;;  %v2025_v30 = vpop.f32.mrb[7].mxu0 }
 0x715   : > { %v1322_v31 = vpop.f32.mrb[8].mxu0 }
 0x716   : > { %v1326_v32 = vmul.f32 0.35355338, %v1322_v31  ;;  %v2035_v33 = vpop.f32.mrb[9].mxu0 }
 0x718   : > { %v1327_v34 = vsel %vm770_vm3, %v1326_v32, -1e+30 }
 0x719   : > { %v1328_v35 = vsel %vm771_vm2, %v1327_v34, -inf }
 0x71a   : > { %1329 = vmax.xlane.f32.xlu0 %v1328_v35 }
 0x730   : > { %1339 = vrot.lane.b32.xlu0 %v2890_v46, %s2503_s22  ;;  %s2416_s22 = scalar_lea.vmem %s2415_s16, 256 }
 0x731   : > { %p2418_p3 = scmp.lt.s32.totalorder %s2416_s22, %s2410_s23 }
 0x733   : > { %p2419_p2 = por %p2418_p3, %p2417_p1 }
 0x734   : > { %1489 = vrot.lane.b32.xlu0 %v2881_v43, %s2504_s14 }
 0x735   : > { %p2420_p0 = pnand %p2419_p2, %p2413_p13 }
 0x7a7   : > { %v1330_v36 = vpop.xlane.xlu0 %1329 }
 0x7a8   : > { %v1331_v37 = vsub.f32 %v1327_v34, %v1330_v36 }
 0x7aa   : > { %v1332_v38 = vmul.f32 1.442695, %v1331_v37 }
 0x7ab   : > { %v1340_v39 = vpop.permute.xlu0 %1339 }
 0x7ac   : > { %2204 = vpow2.f32 %v1332_v38  ;;  %2037 = vmatpush3.msra.mxu1 %v1340_v39 }
 0x7ad   : > { %2046 = vmatprep.subr.mxu1 %v2501_v18 }
 0x7af   : > { %v1490_v48 = vpop.permute.xlu0 %1489 }
 0x7b6   : > { %v2205_v41 = vpop.eup %2204 }
 0x7b7   : > { %v1334_v42 = vsel %vm771_vm2, %v2205_v41, 0.0 }
 0x7b8   : > { %1335 = vadd.xlane.f32.xlu1 %v1334_v42 }
 0x7c9   : > { %1491 = vrot.lane.b32.xlu1 %v2875_v40, %s2504_s14  ;;  %v532_v40 = vld [vmem:[%s3078_s15 + $0x10] sm:$0xff] }
 0x7ca   : > { %2042 = vmatpush3.msra.mxu0 %v532_v40 }
 0x7cb   : > { %2051 = vmatprep.subr.mxu0 %v2501_v18 }
 0x845   : > { %v1336_v44 = vpop.xlane.xlu1 %1335 }
 0x846   : > { %2206 = vrcp.f32 %v1336_v44 }
 0x849   : > { %v1492_v43 = vpop.permute.xlu1 %1491 }
 0x850   : > { %v2207_v45 = vpop.eup %2206 }
 0x851   : > { %v1338_v47 = vmul.f32 %v2207_v45, %v2205_v41 }
 0x853   : > { %2039 = vmatmul.mubr.msk.f32.vlgmr.msra.gmra.mrb[10].mxu1 %vm771_vm2, %v1338_v47 }
 0x854   : > { %2047 = vmatpush3.xpose.msk.msra.mxu1 %vm771_vm2, %v1492_v43  ;;  %2048 = vmatprep.mubr.msk.f32.mxu1 %vm2500_vm1, %v2501_v18 }
 0x855   : > { %2056 = vmatprep.subr.mxu1 %v2501_v18 }
 0x857   : > { %2049 = vmatmul.mubr.msk.f32.vlgmr.msra.gmra.mrb[12].mxu1 %vm771_vm2, %v1490_v48 }
 0x858   : > { %2058 = vmatprep.mubr.msk.f32.mxu1 %vm2500_vm1, %v2501_v18  ;;  %2057 = vmatpush3.msra.mxu1 %v533_v51 }
 0x926   : > { %v1411_v49 = vpop.f32.mrb[10].mxu1 }
 0x927   : > { %v2040_v50 = vpop.f32.mrb[11].mxu1  ;;  %2044 = vmatmul.mubr.msk.f32.vlgmr.msra.gmra.mrb[10].mxu0 %vm771_vm2, %v1411_v49 }
 0x928   : > { %2053 = vmatprep.mubr.msk.f32.mxu0 %vm2500_vm1, %v2501_v18 }
 0x92a   : > { %v1563_v53 = vpop.f32.mrb[12].mxu1 }
 0x92b   : > { %v1567_v54 = vmul.f32 0.35355338, %v1563_v53  ;;  %v2050_v55 = vpop.f32.mrb[13].mxu1 }
 0x92d   : > { %v1568_v56 = vsel %vm770_vm3, %v1567_v54, -1e+30 }
 0x92e   : > { %v1569_v57 = vsel %vm771_vm2, %v1568_v56, -inf }
 0x92f   : > { %1570 = vmax.xlane.f32.xlu0 %v1569_v57 }
 0x945   : > { %1580 = vrot.lane.b32.xlu0 %v2890_v46, %s2504_s14 }
 0x9bc   : > { %v1571_v58 = vpop.xlane.xlu0 %1570 }
 0x9bd   : > { %v1572_v59 = vsub.f32 %v1568_v56, %v1571_v58 }
 0x9bf   : > { %v1573_v60 = vmul.f32 1.442695, %v1572_v59 }
 0x9c0   : > { %v1581_v61 = vpop.permute.xlu0 %1580 }
 0x9c1   : > { %2208 = vpow2.f32 %v1573_v60  ;;  %2052 = vmatpush3.msra.mxu0 %v1581_v61 }
 0x9cb   : > { %v2209_v18 = vpop.eup %2208 }
 0x9cc   : > { %v1575_v62 = vsel %vm771_vm2, %v2209_v18, 0.0 }
 0x9cd   : > { %1576 = vadd.xlane.f32.xlu1 %v1575_v62 }
 0x9fa   : > { %v1484_v52 = vpop.f32.mrb[10].mxu0 }
 0x9fb   : > { %v1488_v63 = vadd.f32 %v1484_v52, %v1245_v29  ;;  %v2045_v46 = vpop.f32.mrb[11].mxu0 }
 0xa5a   : > { %v1577_v1 = vpop.xlane.xlu1 %1576 }
 0xa5b   : > { %2210 = vrcp.f32 %v1577_v1 }
 0xa65   : > { %v2211_v2 = vpop.eup %2210 }
 0xa66   : > { %v1579_v3 = vmul.f32 %v2211_v2, %v2209_v18 }
 0xa68   : > { %2054 = vmatmul.mubr.msk.f32.vlgmr.msra.gmra.mrb[12].mxu0 %vm771_vm2, %v1579_v3 }
 0xb3b   : > { %v1652_v4 = vpop.f32.mrb[12].mxu0 }
 0xb3c   : > { %v2055_v5 = vpop.f32.mrb[13].mxu0  ;;  %2059 = vmatmul.mubr.msk.f32.vlgmr.msra.gmra.mrb[14].mxu1 %vm771_vm2, %v1652_v4 }
 0xc0f   : > { %v1725_v7 = vpop.f32.mrb[14].mxu1 }
 0xc10   : > { %v1729_v8 = vadd.f32 %v1725_v7, %v1488_v63  ;;  %v2060_v9 = vpop.f32.mrb[15].mxu1 }
 0xc12   : > { %v1736_v10 = vadd.f32 %v1924_v6, %v1729_v8 }
 0xc14   : > { %v1737_v11 = vadd.f32 %v1736_v10, %v2848_v0 }
 0xc16   : > { %1738 = vst.msk [vmem:[%s482_s21] sm:$0xff] %vm486_vm0, %v1737_v11 }
 0xc17   : > { %2423 = shalt.err (!%p2420_p0)
}
 0xc18   : > { %s2424_s29 = scalar_lea.hbm %s2996_s28, 128  ;;  %s2428_s21 = scalar_lea.hbm %s3080_s12, 1024 }
 0xc19   : > { %p2425_p9 = scmp.ne.s32.totalorder %s2996_s28, %s2424_s29  ;;  %p2429_p7 = scmp.lt.u32.totalorder %s2996_s28, %s3080_s12 }
 0xc1a   : > { %p2430_p4 = scmp.lt.u32.totalorder %s2428_s21, %s2424_s29  ;;  %p2432_p5 = scmp.lt.u32.totalorder %s2424_s29, %s2996_s28 }
 0xc1b   : > { %p2426_p10 = pnand %p2425_p9, %p3081_p8 }
 0xc1c   : > { %p2431_p6 = por %p2430_p4, %p2429_p7 }
 0xc1d   : > { %p2427_p11 = pneg %p2426_p10 }
 0xc1e   : > { %p2433_p12 = por %p2432_p5, %p2431_p6 }
 0xc20   : > { %p2434_p13 = pnand %p2433_p12, %p2427_p11 }
 0xc22   : > { %2437 = shalt.err (!%p2434_p13)
}
 0xc23   : > { %2105 = dma.vmem_to_hbm [thread:$0]  (%p3081_p8), %s2998_s9, 128, %s2996_s28, %s1740_s11  }
 0xc24 PF: > { %p2147_p1 = scmp.ge.s32.totalorder %s2488_s20, 2  ;;  %s1765_s23 = sand.u32 1, %s2476_s17  }
 0xc25   : > { %p3082_p3 = scmp.ne.s32.totalorder %s3069_s13, 0  ;;  %s1766_s25 = scalar_lea.sflag [#allocation4], %s1765_s23 }
 0xc27   : > { %p2131_p2 = pnand %p2147_p1, %p3082_p3 }
 0xc29   : > { %2471 = dma.done.wait (!%p2131_p2), %s1766_s25, 128  }
 0xc2a   : > { %2473 = vsyncadd (!%p2131_p2), %s1766_s25, 4294967168  ;;  %p27_p0 = scmp.ge.s32.totalorder %s2750_s27, 10   ;;  %s3083_s17 = smov %s2480_s18 }
 0xc2b   : > { %s3084_s18 = smov %s2484_s19  ;;  %s3085_s19 = smov %s2761_s30 }
 0xc2c   : > { %s3086_s20 = smov %s2750_s27  ;;  %29 = sbr.rel (!%p27_p0) target bundleno = 13 (0xd), region = 133 }
 0xc33   :  { %1771 = vsyncpa [#allocation3], 1 }
 0xc34   :  { %1773 = vsyncpa [#allocation3 + $0x1], 1 }
 0xc35   :  { %1774 = vsyncpa [#allocation6], 1 }
 0xc36   :  { %1775 = vsyncpa [#allocation9], 1 }
 0xc37   :  { %1776 = vsyncpa [#allocation12], 1 }
 0xc38   :  { %1777 = vsyncpa [#allocation4], 1 }
 0xc39   :  { %1779 = vsyncpa [#allocation4 + $0x1], 1 }

</bundles_post_ra>
